<compile_context>
chip_gen: v7x
topology: tpu7x:2x2x1
jax: 0.10.0
libtpu: 0.0.40
codegen_flags: <defaults>
</compile_context>

<pallas_src>
import functools

import jax
import jax.numpy as jnp
from jax import lax
from jax.experimental import pallas as pl
from jax.experimental.pallas import tpu as pltpu


def _round_up(x, m):
    return ((x + m - 1) // m) * m


def _conv_sym_kernel(x_ref, w_ref, b_ref, o_ref, patch_ref, *,
                     n, h, w, c_in, k_h, k_w, off, k_rows, k_pad):
    """Single grid step: replicate-pad + KxK conv (+bias) for the whole (small) batch.

    x_ref:     (N, C_in, HW)  f32   input, spatial flattened onto the lane axis
    w_ref:     (C_out, K_pad) bf16  im2col weights, zero-padded columns >= Kh*Kw*C_in
    b_ref:     (C_out, 1)     f32   bias
    o_ref:     (N, C_out, HW)       output (lane-dense stores)
    patch_ref: (K_pad, N*HW)  bf16  VMEM scratch im2col patch
    """
    hw = h * w

    # Boundary masks (1, HW), computed in-kernel: no rc_idx input / DMA stream needed.
    pos = lax.broadcasted_iota(jnp.int32, (1, hw), 1)
    if (w & (w - 1)) == 0:
        col = jnp.bitwise_and(pos, w - 1)          # W is a power of two -> AND
    else:
        col = pos % w                              # TODO(synk): non-pow2 W uses vector int mod
    row_first = pos < w
    row_last = pos >= hw - w
    col_first = col == 0
    col_last = col == w - 1

    # Zero the padded patch rows once (padded weight columns are also zero, but
    # uninitialized VMEM could hold NaN bit patterns and NaN * 0 = NaN).
    if k_pad > k_rows:
        patch_ref[pl.ds(k_rows, k_pad - k_rows), :] = jnp.zeros(
            (k_pad - k_rows, n * hw), jnp.bfloat16)

    # Single-step clamped (replicate-edge) shifts along the flattened spatial axis.
    # XLU roll + VPU select; f32 math (v5e-safe), bf16 cast only at the scratch store.
    def down1(v):   # v'[y, x] = v[min(y + 1, h - 1), x]
        return jnp.where(row_last, v, pltpu.roll(v, shift=hw - w, axis=1))

    def up1(v):     # v'[y, x] = v[max(y - 1, 0), x]
        return jnp.where(row_first, v, pltpu.roll(v, shift=w, axis=1))

    def right1(v):  # v'[y, x] = v[y, min(x + 1, w - 1)]
        return jnp.where(col_last, v, pltpu.roll(v, shift=hw - 1, axis=1))

    def left1(v):   # v'[y, x] = v[y, max(x - 1, 0)]
        return jnp.where(col_first, v, pltpu.roll(v, shift=1, axis=1))

    for b in range(n):                      # static unroll; batch folded onto lanes
        xb = x_ref[b]                       # (C_in, HW) f32
        rows = {0: xb}
        for d in range(1, off + 1):
            rows[d] = down1(rows[d - 1])
            rows[-d] = up1(rows[-(d - 1)])
        for kh in range(k_h):
            r = rows[kh - off]
            cols = {0: r}
            for d in range(1, off + 1):
                cols[d] = right1(cols[d - 1])
                cols[-d] = left1(cols[-(d - 1)])
            for kw in range(k_w):
                tap = kh * k_w + kw
                patch_ref[pl.ds(tap * c_in, c_in), pl.ds(b * hw, hw)] = (
                    cols[kw - off].astype(jnp.bfloat16))

    # One fused im2col matmul over all batches (bf16 operands, f32 accumulation).
    acc = jnp.dot(w_ref[...], patch_ref[...],
                  preferred_element_type=jnp.float32)          # (C_out, N*HW) f32
    acc = acc + b_ref[...]                                     # bias broadcast over lanes

    # TODO(synk): Dropout(0.75) applied as eval-mode identity here.
    for b in range(n):
        o_ref[b] = acc[:, b * hw:(b + 1) * hw].astype(o_ref.dtype)


def prepare_conv_sym_params(weight_oihw, bias):
    """One-time parameter prep (hoisted out of the per-call path)."""
    c_out, c_in, k_h, k_w = weight_oihw.shape
    k_rows = k_h * k_w * c_in
    k_pad = _round_up(k_rows, 8)
    w2 = jnp.transpose(weight_oihw, (0, 2, 3, 1)).reshape(c_out, k_rows)
    w2 = w2.astype(jnp.bfloat16)
    if k_pad > k_rows:
        w2 = jnp.pad(w2, ((0, 0), (0, k_pad - k_rows)))        # zero columns for pad rows
    b2 = bias.reshape(c_out, 1).astype(jnp.float32)
    return w2, b2, (c_in, k_h, k_w, k_rows, k_pad)


def conv2d_sym_forward(x_nchw, params, offset):
    """Replicate-pad by `offset`, then KxK valid conv (+bias). Dropout = identity (eval)."""
    w2, b2, (c_in, k_h, k_w, k_rows, k_pad) = params
    n, c_in_x, h, w = x_nchw.shape
    assert c_in_x == c_in
    if (k_h - 1) != 2 * offset or (k_w - 1) != 2 * offset:
        # TODO(synk): non size-preserving offset/kernel combinations need a halo/padded path.
        raise NotImplementedError("conv2d_sym kernel assumes 2*offset == kernel_size - 1")
    c_out = w2.shape[0]
    hw = h * w

    # Free (bitcast) reshape: spatial flattened onto lanes; no transpose, no pad pass.
    x_flat = x_nchw.reshape(n, c_in, hw)

    kernel = functools.partial(_conv_sym_kernel, n=n, h=h, w=w, c_in=c_in,
                               k_h=k_h, k_w=k_w, off=offset,
                               k_rows=k_rows, k_pad=k_pad)

    cost = pl.CostEstimate(
        flops=2 * c_out * k_rows * n * hw,
        transcendentals=0,
        bytes_accessed=(x_flat.size * x_flat.dtype.itemsize
                        + w2.size * 2 + b2.size * 4
                        + n * c_out * hw * x_nchw.dtype.itemsize),
    )

    out_flat = pl.pallas_call(
        kernel,
        out_shape=jax.ShapeDtypeStruct((n, c_out, hw), x_nchw.dtype),
        grid_spec=pltpu.PrefetchScalarGridSpec(
            num_scalar_prefetch=0,
            grid=(1,),  # batch folded onto lanes -> one step (per-step overhead dominates here)
            in_specs=[
                pl.BlockSpec((n, c_in, hw), lambda i: (0, 0, 0)),     # x, whole batch
                pl.BlockSpec((c_out, k_pad), lambda i: (0, 0)),       # weights (resident)
                pl.BlockSpec((c_out, 1), lambda i: (0, 0)),           # bias (resident)
            ],
            out_specs=pl.BlockSpec((n, c_out, hw), lambda i: (0, 0, 0)),
            scratch_shapes=[pltpu.VMEM((k_pad, n * hw), jnp.bfloat16)],  # im2col patch
        ),
        compiler_params=pltpu.CompilerParams(
            dimension_semantics=("arbitrary",),
        ),
        cost_estimate=cost,
    )(x_flat, w2, b2)

    # Free split of the last dim back to (H, W); still NCHW, no transpose.
    return out_flat.reshape(n, c_out, h, w)


if __name__ == "__main__":
    # Conv2d_Sym(ch_in=4, ch_out=8, offset=1, kernel_size=3)
    N, CH_IN, CH_OUT, H, W = 2, 4, 8, 16, 16
    OFFSET, K = 1, 3

    key = jax.random.PRNGKey(0)
    kx, kw_, kb = jax.random.split(key, 3)

    x = jax.random.normal(kx, (N, CH_IN, H, W), dtype=jnp.float32)
    # Deterministic parameter init (Kaiming-uniform-like bound, as in nn.Conv2d).
    fan_in = CH_IN * K * K
    bound = 1.0 / (fan_in ** 0.5)
    weight = jax.random.uniform(kw_, (CH_OUT, CH_IN, K, K),
                                minval=-bound, maxval=bound, dtype=jnp.float32)
    bias = jax.random.uniform(kb, (CH_OUT,), minval=-bound, maxval=bound,
                              dtype=jnp.float32)

    params = prepare_conv_sym_params(weight, bias)   # once-at-load-time prep
    out = conv2d_sym_forward(x, params, OFFSET)
    jax.block_until_ready(out)

    # Reference: replicate pad + VALID conv with operands rounded to bf16 exactly as the
    # kernel's MXU path sees them (f32 accumulation in both), so tolerances stay tight.
    x_bf = x.astype(jnp.bfloat16).astype(jnp.float32)
    w_bf = weight.astype(jnp.bfloat16).astype(jnp.float32)
    x_pad_ref = jnp.pad(x_bf, ((0, 0), (0, 0), (OFFSET, OFFSET), (OFFSET, OFFSET)),
                        mode="edge")
    ref = lax.conv_general_dilated(
        x_pad_ref, w_bf, window_strides=(1, 1), padding="VALID",
        dimension_numbers=("NCHW", "OIHW", "NCHW"),
        precision=lax.Precision.HIGHEST) + bias[None, :, None, None]

    assert out.shape == (N, CH_OUT, H, W), out.shape
    assert jnp.allclose(out, ref, atol=2e-3, rtol=2e-3), float(jnp.max(jnp.abs(out - ref)))

    print("KERNEL_OK")
</pallas_src>

<mosaic_0001>
module attributes {stable_mosaic.version = 11 : i64} {
  func.func @_conv_sym_kernel(%arg0: i32, %arg1: memref<2x4x256xf32, #tpu.memory_space<vmem>>, %arg2: memref<8x40xbf16, #tpu.memory_space<vmem>>, %arg3: memref<8x1xf32, #tpu.memory_space<vmem>>, %arg4: memref<2x8x256xf32, #tpu.memory_space<vmem>>, %arg5: memref<40x512xbf16, #tpu.memory_space<vmem>>) attributes {dimension_semantics = [#tpu.dimension_semantics<arbitrary>], iteration_bounds = array<i64: 1>, scalar_prefetch = 0 : i64, scratch_operands = 1 : i64, tpu.core_type = #tpu.core_type<tc>, window_params = [{pipeline_mode = #tpu.pipeline_mode<synchronous>, transform_indices = @transform_0, window_bounds = array<i64: 2, 4, 256>}, {pipeline_mode = #tpu.pipeline_mode<synchronous>, transform_indices = @transform_1, window_bounds = array<i64: 8, 40>}, {pipeline_mode = #tpu.pipeline_mode<synchronous>, transform_indices = @transform_2, window_bounds = array<i64: 8, 1>}, {pipeline_mode = #tpu.pipeline_mode<synchronous>, transform_indices = @transform_3, window_bounds = array<i64: 2, 8, 256>}]} {
    %0 = tpu.iota {dimensions = array<i32: 1>} : vector<1x256xi32>
    %c15_i32 = arith.constant 15 : i32
    %1 = vector.broadcast %c15_i32 : i32 to vector<1x256xi32>
    %2 = arith.andi %0, %1 : vector<1x256xi32>
    %c16_i32 = arith.constant 16 : i32
    %3 = vector.broadcast %c16_i32 : i32 to vector<1x256xi32>
    %4 = arith.cmpi slt, %0, %3 : vector<1x256xi32>
    %c240_i32 = arith.constant 240 : i32
    %5 = vector.broadcast %c240_i32 : i32 to vector<1x256xi32>
    %6 = arith.cmpi sge, %0, %5 : vector<1x256xi32>
    %c0_i32 = arith.constant 0 : i32
    %7 = vector.broadcast %c0_i32 : i32 to vector<1x256xi32>
    %8 = arith.cmpi eq, %2, %7 : vector<1x256xi32>
    %c15_i32_0 = arith.constant 15 : i32
    %9 = vector.broadcast %c15_i32_0 : i32 to vector<1x256xi32>
    %10 = arith.cmpi eq, %2, %9 : vector<1x256xi32>
    %cst = arith.constant 0.000000e+00 : bf16
    %11 = vector.broadcast %cst : bf16 to vector<4x512xbf16>
    %c36 = arith.constant 36 : index
    %c0 = arith.constant 0 : index
    %12 = vector.load %arg5[%c36, %c0] : memref<40x512xbf16, #tpu.memory_space<vmem>>, vector<4x512xbf16>
    tpu.vector_store %arg5[%c36, %c0], %11 {strides = array<i32>} : memref<40x512xbf16, #tpu.memory_space<vmem>>, vector<4x512xbf16>,
    %c0_1 = arith.constant 0 : index
    %c0_2 = arith.constant 0 : index
    %c0_3 = arith.constant 0 : index
    %13 = vector.load %arg1[%c0_1, %c0_2, %c0_3] : memref<2x4x256xf32, #tpu.memory_space<vmem>>, vector<1x4x256xf32>
    %14 = vector.shape_cast %13 : vector<1x4x256xf32> to vector<4x256xf32>
    %c240_i32_4 = arith.constant 240 : i32
    %15 = tpu.dynamic_rotate %14 by %c240_i32_4 dim 1 : vector<4x256xf32>, i32 -> vector<4x256xf32>
    %16 = vector.shape_cast %6 : vector<1x256xi1> to vector<1x256xi1>
    %17 = vector.broadcast %16 : vector<1x256xi1> to vector<4x256xi1>
    %18 = arith.select %17, %14, %15 : vector<4x256xi1>, vector<4x256xf32>
    %c16_i32_5 = arith.constant 16 : i32
    %19 = tpu.dynamic_rotate %14 by %c16_i32_5 dim 1 : vector<4x256xf32>, i32 -> vector<4x256xf32>
    %20 = vector.shape_cast %4 : vector<1x256xi1> to vector<1x256xi1>
    %21 = vector.broadcast %20 : vector<1x256xi1> to vector<4x256xi1>
    %22 = arith.select %21, %14, %19 : vector<4x256xi1>, vector<4x256xf32>
    %c255_i32 = arith.constant 255 : i32
    %23 = tpu.dynamic_rotate %22 by %c255_i32 dim 1 : vector<4x256xf32>, i32 -> vector<4x256xf32>
    %24 = vector.shape_cast %10 : vector<1x256xi1> to vector<1x256xi1>
    %25 = vector.broadcast %24 : vector<1x256xi1> to vector<4x256xi1>
    %26 = arith.select %25, %22, %23 : vector<4x256xi1>, vector<4x256xf32>
    %c1_i32 = arith.constant 1 : i32
    %27 = tpu.dynamic_rotate %22 by %c1_i32 dim 1 : vector<4x256xf32>, i32 -> vector<4x256xf32>
    %28 = vector.shape_cast %8 : vector<1x256xi1> to vector<1x256xi1>
    %29 = vector.broadcast %28 : vector<1x256xi1> to vector<4x256xi1>
    %30 = arith.select %29, %22, %27 : vector<4x256xi1>, vector<4x256xf32>
    %31 = arith.truncf %30 : vector<4x256xf32> to vector<4x256xbf16>
    %c0_6 = arith.constant 0 : index
    %c0_7 = arith.constant 0 : index
    %32 = vector.load %arg5[%c0_6, %c0_7] : memref<40x512xbf16, #tpu.memory_space<vmem>>, vector<4x256xbf16>
    tpu.vector_store %arg5[%c0_6, %c0_7], %31 {strides = array<i32>} : memref<40x512xbf16, #tpu.memory_space<vmem>>, vector<4x256xbf16>,
    %33 = arith.truncf %22 : vector<4x256xf32> to vector<4x256xbf16>
    %c4 = arith.constant 4 : index
    %c0_8 = arith.constant 0 : index
    %34 = vector.load %arg5[%c4, %c0_8] : memref<40x512xbf16, #tpu.memory_space<vmem>>, vector<4x256xbf16>
    tpu.vector_store %arg5[%c4, %c0_8], %33 {strides = array<i32>} : memref<40x512xbf16, #tpu.memory_space<vmem>>, vector<4x256xbf16>,
    %35 = arith.truncf %26 : vector<4x256xf32> to vector<4x256xbf16>
    %c8 = arith.constant 8 : index
    %c0_9 = arith.constant 0 : index
    %36 = vector.load %arg5[%c8, %c0_9] : memref<40x512xbf16, #tpu.memory_space<vmem>>, vector<4x256xbf16>
    tpu.vector_store %arg5[%c8, %c0_9], %35 {strides = array<i32>} : memref<40x512xbf16, #tpu.memory_space<vmem>>, vector<4x256xbf16>,
    %c255_i32_10 = arith.constant 255 : i32
    %37 = tpu.dynamic_rotate %14 by %c255_i32_10 dim 1 : vector<4x256xf32>, i32 -> vector<4x256xf32>
    %38 = vector.shape_cast %10 : vector<1x256xi1> to vector<1x256xi1>
    %39 = vector.broadcast %38 : vector<1x256xi1> to vector<4x256xi1>
    %40 = arith.select %39, %14, %37 : vector<4x256xi1>, vector<4x256xf32>
    %c1_i32_11 = arith.constant 1 : i32
    %41 = tpu.dynamic_rotate %14 by %c1_i32_11 dim 1 : vector<4x256xf32>, i32 -> vector<4x256xf32>
    %42 = vector.shape_cast %8 : vector<1x256xi1> to vector<1x256xi1>
    %43 = vector.broadcast %42 : vector<1x256xi1> to vector<4x256xi1>
    %44 = arith.select %43, %14, %41 : vector<4x256xi1>, vector<4x256xf32>
    %45 = arith.truncf %44 : vector<4x256xf32> to vector<4x256xbf16>
    %c12 = arith.constant 12 : index
    %c0_12 = arith.constant 0 : index
    %46 = vector.load %arg5[%c12, %c0_12] : memref<40x512xbf16, #tpu.memory_space<vmem>>, vector<4x256xbf16>
    tpu.vector_store %arg5[%c12, %c0_12], %45 {strides = array<i32>} : memref<40x512xbf16, #tpu.memory_space<vmem>>, vector<4x256xbf16>,
    %47 = arith.truncf %14 : vector<4x256xf32> to vector<4x256xbf16>
    %c16 = arith.constant 16 : index
    %c0_13 = arith.constant 0 : index
    %48 = vector.load %arg5[%c16, %c0_13] : memref<40x512xbf16, #tpu.memory_space<vmem>>, vector<4x256xbf16>
    tpu.vector_store %arg5[%c16, %c0_13], %47 {strides = array<i32>} : memref<40x512xbf16, #tpu.memory_space<vmem>>, vector<4x256xbf16>,
    %49 = arith.truncf %40 : vector<4x256xf32> to vector<4x256xbf16>
    %c20 = arith.constant 20 : index
    %c0_14 = arith.constant 0 : index
    %50 = vector.load %arg5[%c20, %c0_14] : memref<40x512xbf16, #tpu.memory_space<vmem>>, vector<4x256xbf16>
    tpu.vector_store %arg5[%c20, %c0_14], %49 {strides = array<i32>} : memref<40x512xbf16, #tpu.memory_space<vmem>>, vector<4x256xbf16>,
    %c255_i32_15 = arith.constant 255 : i32
    %51 = tpu.dynamic_rotate %18 by %c255_i32_15 dim 1 : vector<4x256xf32>, i32 -> vector<4x256xf32>
    %52 = vector.shape_cast %10 : vector<1x256xi1> to vector<1x256xi1>
    %53 = vector.broadcast %52 : vector<1x256xi1> to vector<4x256xi1>
    %54 = arith.select %53, %18, %51 : vector<4x256xi1>, vector<4x256xf32>
    %c1_i32_16 = arith.constant 1 : i32
    %55 = tpu.dynamic_rotate %18 by %c1_i32_16 dim 1 : vector<4x256xf32>, i32 -> vector<4x256xf32>
    %56 = vector.shape_cast %8 : vector<1x256xi1> to vector<1x256xi1>
    %57 = vector.broadcast %56 : vector<1x256xi1> to vector<4x256xi1>
    %58 = arith.select %57, %18, %55 : vector<4x256xi1>, vector<4x256xf32>
    %59 = arith.truncf %58 : vector<4x256xf32> to vector<4x256xbf16>
    %c24 = arith.constant 24 : index
    %c0_17 = arith.constant 0 : index
    %60 = vector.load %arg5[%c24, %c0_17] : memref<40x512xbf16, #tpu.memory_space<vmem>>, vector<4x256xbf16>
    tpu.vector_store %arg5[%c24, %c0_17], %59 {strides = array<i32>} : memref<40x512xbf16, #tpu.memory_space<vmem>>, vector<4x256xbf16>,
    %61 = arith.truncf %18 : vector<4x256xf32> to vector<4x256xbf16>
    %c28 = arith.constant 28 : index
    %c0_18 = arith.constant 0 : index
    %62 = vector.load %arg5[%c28, %c0_18] : memref<40x512xbf16, #tpu.memory_space<vmem>>, vector<4x256xbf16>
    tpu.vector_store %arg5[%c28, %c0_18], %61 {strides = array<i32>} : memref<40x512xbf16, #tpu.memory_space<vmem>>, vector<4x256xbf16>,
    %63 = arith.truncf %54 : vector<4x256xf32> to vector<4x256xbf16>
    %c32 = arith.constant 32 : index
    %c0_19 = arith.constant 0 : index
    %64 = vector.load %arg5[%c32, %c0_19] : memref<40x512xbf16, #tpu.memory_space<vmem>>, vector<4x256xbf16>
    tpu.vector_store %arg5[%c32, %c0_19], %63 {strides = array<i32>} : memref<40x512xbf16, #tpu.memory_space<vmem>>, vector<4x256xbf16>,
    %c1 = arith.constant 1 : index
    %c0_20 = arith.constant 0 : index
    %c0_21 = arith.constant 0 : index
    %65 = vector.load %arg1[%c1, %c0_20, %c0_21] : memref<2x4x256xf32, #tpu.memory_space<vmem>>, vector<1x4x256xf32>
    %66 = vector.shape_cast %65 : vector<1x4x256xf32> to vector<4x256xf32>
    %c240_i32_22 = arith.constant 240 : i32
    %67 = tpu.dynamic_rotate %66 by %c240_i32_22 dim 1 : vector<4x256xf32>, i32 -> vector<4x256xf32>
    %68 = vector.shape_cast %6 : vector<1x256xi1> to vector<1x256xi1>
    %69 = vector.broadcast %68 : vector<1x256xi1> to vector<4x256xi1>
    %70 = arith.select %69, %66, %67 : vector<4x256xi1>, vector<4x256xf32>
    %c16_i32_23 = arith.constant 16 : i32
    %71 = tpu.dynamic_rotate %66 by %c16_i32_23 dim 1 : vector<4x256xf32>, i32 -> vector<4x256xf32>
    %72 = vector.shape_cast %4 : vector<1x256xi1> to vector<1x256xi1>
    %73 = vector.broadcast %72 : vector<1x256xi1> to vector<4x256xi1>
    %74 = arith.select %73, %66, %71 : vector<4x256xi1>, vector<4x256xf32>
    %c255_i32_24 = arith.constant 255 : i32
    %75 = tpu.dynamic_rotate %74 by %c255_i32_24 dim 1 : vector<4x256xf32>, i32 -> vector<4x256xf32>
    %76 = vector.shape_cast %10 : vector<1x256xi1> to vector<1x256xi1>
    %77 = vector.broadcast %76 : vector<1x256xi1> to vector<4x256xi1>
    %78 = arith.select %77, %74, %75 : vector<4x256xi1>, vector<4x256xf32>
    %c1_i32_25 = arith.constant 1 : i32
    %79 = tpu.dynamic_rotate %74 by %c1_i32_25 dim 1 : vector<4x256xf32>, i32 -> vector<4x256xf32>
    %80 = vector.shape_cast %8 : vector<1x256xi1> to vector<1x256xi1>
    %81 = vector.broadcast %80 : vector<1x256xi1> to vector<4x256xi1>
    %82 = arith.select %81, %74, %79 : vector<4x256xi1>, vector<4x256xf32>
    %83 = arith.truncf %82 : vector<4x256xf32> to vector<4x256xbf16>
    %c0_26 = arith.constant 0 : index
    %c256 = arith.constant 256 : index
    %84 = vector.load %arg5[%c0_26, %c256] : memref<40x512xbf16, #tpu.memory_space<vmem>>, vector<4x256xbf16>
    tpu.vector_store %arg5[%c0_26, %c256], %83 {strides = array<i32>} : memref<40x512xbf16, #tpu.memory_space<vmem>>, vector<4x256xbf16>,
    %85 = arith.truncf %74 : vector<4x256xf32> to vector<4x256xbf16>
    %c4_27 = arith.constant 4 : index
    %c256_28 = arith.constant 256 : index
    %86 = vector.load %arg5[%c4_27, %c256_28] : memref<40x512xbf16, #tpu.memory_space<vmem>>, vector<4x256xbf16>
    tpu.vector_store %arg5[%c4_27, %c256_28], %85 {strides = array<i32>} : memref<40x512xbf16, #tpu.memory_space<vmem>>, vector<4x256xbf16>,
    %87 = arith.truncf %78 : vector<4x256xf32> to vector<4x256xbf16>
    %c8_29 = arith.constant 8 : index
    %c256_30 = arith.constant 256 : index
    %88 = vector.load %arg5[%c8_29, %c256_30] : memref<40x512xbf16, #tpu.memory_space<vmem>>, vector<4x256xbf16>
    tpu.vector_store %arg5[%c8_29, %c256_30], %87 {strides = array<i32>} : memref<40x512xbf16, #tpu.memory_space<vmem>>, vector<4x256xbf16>,
    %c255_i32_31 = arith.constant 255 : i32
    %89 = tpu.dynamic_rotate %66 by %c255_i32_31 dim 1 : vector<4x256xf32>, i32 -> vector<4x256xf32>
    %90 = vector.shape_cast %10 : vector<1x256xi1> to vector<1x256xi1>
    %91 = vector.broadcast %90 : vector<1x256xi1> to vector<4x256xi1>
    %92 = arith.select %91, %66, %89 : vector<4x256xi1>, vector<4x256xf32>
    %c1_i32_32 = arith.constant 1 : i32
    %93 = tpu.dynamic_rotate %66 by %c1_i32_32 dim 1 : vector<4x256xf32>, i32 -> vector<4x256xf32>
    %94 = vector.shape_cast %8 : vector<1x256xi1> to vector<1x256xi1>
    %95 = vector.broadcast %94 : vector<1x256xi1> to vector<4x256xi1>
    %96 = arith.select %95, %66, %93 : vector<4x256xi1>, vector<4x256xf32>
    %97 = arith.truncf %96 : vector<4x256xf32> to vector<4x256xbf16>
    %c12_33 = arith.constant 12 : index
    %c256_34 = arith.constant 256 : index
    %98 = vector.load %arg5[%c12_33, %c256_34] : memref<40x512xbf16, #tpu.memory_space<vmem>>, vector<4x256xbf16>
    tpu.vector_store %arg5[%c12_33, %c256_34], %97 {strides = array<i32>} : memref<40x512xbf16, #tpu.memory_space<vmem>>, vector<4x256xbf16>,
    %99 = arith.truncf %66 : vector<4x256xf32> to vector<4x256xbf16>
    %c16_35 = arith.constant 16 : index
    %c256_36 = arith.constant 256 : index
    %100 = vector.load %arg5[%c16_35, %c256_36] : memref<40x512xbf16, #tpu.memory_space<vmem>>, vector<4x256xbf16>
    tpu.vector_store %arg5[%c16_35, %c256_36], %99 {strides = array<i32>} : memref<40x512xbf16, #tpu.memory_space<vmem>>, vector<4x256xbf16>,
    %101 = arith.truncf %92 : vector<4x256xf32> to vector<4x256xbf16>
    %c20_37 = arith.constant 20 : index
    %c256_38 = arith.constant 256 : index
    %102 = vector.load %arg5[%c20_37, %c256_38] : memref<40x512xbf16, #tpu.memory_space<vmem>>, vector<4x256xbf16>
    tpu.vector_store %arg5[%c20_37, %c256_38], %101 {strides = array<i32>} : memref<40x512xbf16, #tpu.memory_space<vmem>>, vector<4x256xbf16>,
    %c255_i32_39 = arith.constant 255 : i32
    %103 = tpu.dynamic_rotate %70 by %c255_i32_39 dim 1 : vector<4x256xf32>, i32 -> vector<4x256xf32>
    %104 = vector.shape_cast %10 : vector<1x256xi1> to vector<1x256xi1>
    %105 = vector.broadcast %104 : vector<1x256xi1> to vector<4x256xi1>
    %106 = arith.select %105, %70, %103 : vector<4x256xi1>, vector<4x256xf32>
    %c1_i32_40 = arith.constant 1 : i32
    %107 = tpu.dynamic_rotate %70 by %c1_i32_40 dim 1 : vector<4x256xf32>, i32 -> vector<4x256xf32>
    %108 = vector.shape_cast %8 : vector<1x256xi1> to vector<1x256xi1>
    %109 = vector.broadcast %108 : vector<1x256xi1> to vector<4x256xi1>
    %110 = arith.select %109, %70, %107 : vector<4x256xi1>, vector<4x256xf32>
    %111 = arith.truncf %110 : vector<4x256xf32> to vector<4x256xbf16>
    %c24_41 = arith.constant 24 : index
    %c256_42 = arith.constant 256 : index
    %112 = vector.load %arg5[%c24_41, %c256_42] : memref<40x512xbf16, #tpu.memory_space<vmem>>, vector<4x256xbf16>
    tpu.vector_store %arg5[%c24_41, %c256_42], %111 {strides = array<i32>} : memref<40x512xbf16, #tpu.memory_space<vmem>>, vector<4x256xbf16>,
    %113 = arith.truncf %70 : vector<4x256xf32> to vector<4x256xbf16>
    %c28_43 = arith.constant 28 : index
    %c256_44 = arith.constant 256 : index
    %114 = vector.load %arg5[%c28_43, %c256_44] : memref<40x512xbf16, #tpu.memory_space<vmem>>, vector<4x256xbf16>
    tpu.vector_store %arg5[%c28_43, %c256_44], %113 {strides = array<i32>} : memref<40x512xbf16, #tpu.memory_space<vmem>>, vector<4x256xbf16>,
    %115 = arith.truncf %106 : vector<4x256xf32> to vector<4x256xbf16>
    %c32_45 = arith.constant 32 : index
    %c256_46 = arith.constant 256 : index
    %116 = vector.load %arg5[%c32_45, %c256_46] : memref<40x512xbf16, #tpu.memory_space<vmem>>, vector<4x256xbf16>
    tpu.vector_store %arg5[%c32_45, %c256_46], %115 {strides = array<i32>} : memref<40x512xbf16, #tpu.memory_space<vmem>>, vector<4x256xbf16>,
    %c0_47 = arith.constant 0 : index
    %c0_48 = arith.constant 0 : index
    %117 = vector.load %arg2[%c0_47, %c0_48] : memref<8x40xbf16, #tpu.memory_space<vmem>>, vector<8x40xbf16>
    %c0_49 = arith.constant 0 : index
    %c0_50 = arith.constant 0 : index
    %118 = vector.load %arg5[%c0_49, %c0_50] : memref<40x512xbf16, #tpu.memory_space<vmem>>, vector<40x512xbf16>
    %cst_51 = arith.constant dense<0.000000e+00> : vector<8x512xf32>
    %119 = tpu.matmul %117, %118, %cst_51 {dimension_numbers = #tpu.dot_dimension_numbers<[1], [0], [0], [1], [0, 0, 1, 1], [], []>} : vector<8x40xbf16>, vector<40x512xbf16>, vector<8x512xf32> -> vector<8x512xf32>
    %c0_52 = arith.constant 0 : index
    %c0_53 = arith.constant 0 : index
    %120 = vector.load %arg3[%c0_52, %c0_53] : memref<8x1xf32, #tpu.memory_space<vmem>>, vector<8x1xf32>
    %121 = vector.broadcast %120 : vector<8x1xf32> to vector<8x512xf32>
    %122 = arith.addf %119, %121 : vector<8x512xf32>
    %123 = vector.extract_strided_slice %122 {offsets = [0, 0], sizes = [8, 256], strides = [1, 1]} : vector<8x512xf32> to vector<8x256xf32>
    %c0_54 = arith.constant 0 : index
    %c0_55 = arith.constant 0 : index
    %c0_56 = arith.constant 0 : index
    %124 = vector.load %arg4[%c0_54, %c0_55, %c0_56] : memref<2x8x256xf32, #tpu.memory_space<vmem>>, vector<1x8x256xf32>
    %125 = vector.shape_cast %124 : vector<1x8x256xf32> to vector<8x256xf32>
    %126 = vector.shape_cast %123 : vector<8x256xf32> to vector<1x8x256xf32>
    tpu.vector_store %arg4[%c0_54, %c0_55, %c0_56], %126 {strides = array<i32>} : memref<2x8x256xf32, #tpu.memory_space<vmem>>, vector<1x8x256xf32>,
    %127 = vector.extract_strided_slice %122 {offsets = [0, 256], sizes = [8, 256], strides = [1, 1]} : vector<8x512xf32> to vector<8x256xf32>
    %c1_57 = arith.constant 1 : index
    %c0_58 = arith.constant 0 : index
    %c0_59 = arith.constant 0 : index
    %128 = vector.load %arg4[%c1_57, %c0_58, %c0_59] : memref<2x8x256xf32, #tpu.memory_space<vmem>>, vector<1x8x256xf32>
    %129 = vector.shape_cast %128 : vector<1x8x256xf32> to vector<8x256xf32>
    %130 = vector.shape_cast %127 : vector<8x256xf32> to vector<1x8x256xf32>
    tpu.vector_store %arg4[%c1_57, %c0_58, %c0_59], %130 {strides = array<i32>} : memref<2x8x256xf32, #tpu.memory_space<vmem>>, vector<1x8x256xf32>,
    return
  }
  func.func @transform_0(%arg0: i32) -> (i32, i32, i32) {
    %c0_i32 = arith.constant 0 : i32
    %c0_i32_0 = arith.constant 0 : i32
    %c0_i32_1 = arith.constant 0 : i32
    %c0_i32_2 = arith.constant 0 : i32
    return %c0_i32, %c0_i32_0, %c0_i32_1 : i32, i32, i32
  }
  func.func @transform_1(%arg0: i32) -> (i32, i32) {
    %c0_i32 = arith.constant 0 : i32
    %c0_i32_0 = arith.constant 0 : i32
    %c0_i32_1 = arith.constant 0 : i32
    return %c0_i32, %c0_i32_0 : i32, i32
  }
  func.func @transform_2(%arg0: i32) -> (i32, i32) {
    %c0_i32 = arith.constant 0 : i32
    %c0_i32_0 = arith.constant 0 : i32
    %c0_i32_1 = arith.constant 0 : i32
    return %c0_i32, %c0_i32_0 : i32, i32
  }
  func.func @transform_3(%arg0: i32) -> (i32, i32, i32) {
    %c0_i32 = arith.constant 0 : i32
    %c0_i32_0 = arith.constant 0 : i32
    %c0_i32_1 = arith.constant 0 : i32
    %c0_i32_2 = arith.constant 0 : i32
    return %c0_i32, %c0_i32_0, %c0_i32_1 : i32, i32, i32
  }
}

</mosaic_0001>

<bundles_post_ra>
// kernel: tpu_custom_call.1
= control target key start
LH: loop header
LB: loop body
LE: loop exit
PB: predicated region body
PF: predicated region fallthrough
CT: control target
= control target key end

     0   :  { %8 = vsyncpa [#allocation4], 0  ;;  %s1065_s0 = inlined_call_operand.hbm [shape: f32[2,4,256], index: 0, kind: input, shape index: {}]   ;;  %s1066_s1 = inlined_call_operand.vmem [shape: bf16[8,40], index: 1, kind: input, shape index: {}]   ;;  %s1067_s2 = inlined_call_operand.vmem [shape: f32[8,1], index: 2, kind: input, shape index: {}]   ;;  %s1068_s3 = inlined_call_operand.hbm [shape: f32[2,8,256], index: 3, kind: output, shape index: {}]  }
   0x1   :  { %9 = vsyncpa [#allocation5], 0  ;;  %s768_s12 = smov [#allocation3]   ;;  %s720_s16 = scalar_lea.hbm %s1065_s0, 256 }
   0x2   :  { %s15_s13 = sshll.u32 %s768_s12, 4  ;;  %p721_p0 = scmp.ne.s32.totalorder %s1065_s0, %s720_s16  ;;  %s16_s13 = int_to_ptr.vmem [resolvable:$true] %s15_s13 }
   0x3   :  { %p724_p1 = scmp.lt.u32.totalorder %s720_s16, %s1065_s0 }
   0x5   :  { %p726_p2 = pnand %p724_p1, %p721_p0 }
   0x7   :  { %729 = shalt.err (!%p726_p2)
}
   0x8   :  { %s730_s21 = scalar_lea.vmem %s16_s13, 256  ;;  %p735_p4 = scmp.lt.s32.totalorder %s16_s13, %s16_s13 }
   0x9   :  { %p731_p3 = scmp.ne.s32.totalorder %s16_s13, %s730_s21  ;;  %p736_p5 = scmp.lt.s32.totalorder %s730_s21, %s730_s21 }
   0xb   :  { %p737_p6 = por %p736_p5, %p735_p4 }
   0xd   :  { %p738_p7 = pnand %p737_p6, %p731_p3 }
   0xf   :  { %741 = shalt.err (!%p738_p7)
}
  0x10   :  { %s769_s22 = smov 128   ;;  %s770_s23 = smov 8  }
  0x11   :  { %21 = dma.hbm_to_vmem [thread:$0]  %s1065_s0, 256, %s16_s13, [#allocation4], %s769_s22, %s769_s22, %s770_s23  }
  0x12   :  { %764 = dma.done.wait [#allocation4], 256  }
  0x13   :  { %765 = vsyncadd [#allocation4], 4294967040  ;;  %v810_v0 = vld [vmem:[#allocation3] sm:$0xff]  ;;  %v812_v1 = vld [vmem:[#allocation3 + $0x8] sm:$0xff]  ;;  %s771_s26 = smov 16   ;;  %s772_s0 = smov 112   ;;  %v30_v6 = vlaneseq }
  0x14   :  { %v816_v2 = vcombine.high %v810_v0, %v810_v0  ;;  %v820_v3 = vcombine.high %v812_v1, %v812_v1  ;;  %s773_s27 = smov 1   ;;  %s774_s28 = smov 127   ;;  %vm442_vm9 = vcmask 1043456   ;;  %vm438_vm10 = vcmask 326656  }
  0x15   :  { %v832_v7 = vand.u32 127, %v30_v6  ;;  %s776_s5 = smov [#allocation6]  }
  0x16   :  { %v621_v4 = vpack.i.bf16 %v816_v2, %v810_v0  ;;  %v626_v5 = vpack.i.bf16 %v820_v3, %v812_v1  ;;  %v597_v9 = vpack.c.bf16 %v816_v2, %v810_v0  ;;  %v606_v10 = vpack.c.bf16 %v820_v3, %v812_v1  ;;  %s547_s6 = sshll.u32 %s776_s5, 4  ;;  %s548_s6 = int_to_ptr.vmem [resolvable:$true] %s547_s6 }
  0x17   :  { %v32_v8 = vadd.s32 128, %v832_v7  ;;  %vm35_vm0 = vcmp.lt.s32.totalorder %v832_v7, 16  ;;  %vm53_vm2 = vcmp.lt.s32.totalorder %v832_v7, 112  ;;  %v33_v27 = vand.u32 15, %v832_v7  ;;  %p747_p9 = scmp.lt.s32.totalorder %s548_s6, %s548_s6 }
  0x18   :  { %622 = vrot.lane.b32.xlu0 %v621_v4, %s771_s26  ;;  %632 = vrot.lane.b32.xlu1 %v621_v4, %s772_s0  ;;  %162 = vst [vmem:[#allocation2 + $0x20] sm:$0x33] %v597_v9  ;;  %316 = vst [vmem:[#allocation2 + $0x28] sm:$0x33] %v606_v10  ;;  %vm91_vm5 = vcmp.lt.s32.totalorder %v832_v7, 1  ;;  %vm78_vm8 = vcmp.lt.s32.totalorder %v832_v7, 127 }
  0x19   :  { %v34_v12 = vand.u32 15, %v32_v8  ;;  %vm38_vm1 = vcmp.ge.s32.totalorder %v32_v8, 240  ;;  %vm907_vm6 = vcmp.eq.s32.totalorder %v33_v27, 0  ;;  %vm911_vm7 = vcmp.eq.s32.totalorder %v33_v27, 15 }
  0x1b   :  { %vm858_vm3 = vcmp.eq.s32.totalorder %v34_v12, 0  ;;  %vm871_vm4 = vcmp.eq.s32.totalorder %v34_v12, 15 }
  0x1c   :  { %627 = vrot.lane.b32.xlu0 %v626_v5, %s771_s26  ;;  %637 = vrot.lane.b32.xlu1 %v626_v5, %s772_s0 }
  0x20   :  { %647 = vrot.lane.b32.xlu1 %v626_v5, %s773_s27  ;;  %642 = vrot.lane.b32.xlu0 %v621_v4, %s773_s27 }
  0x24   :  { %657 = vrot.lane.b32.xlu1 %v626_v5, %s774_s28  ;;  %652 = vrot.lane.b32.xlu0 %v621_v4, %s774_s28 }
  0x8a   :  { %v623_v11 = vpop.permute.xlu0 %622  ;;  %v633_v13 = vpop.permute.xlu1 %632 }
  0x8b   :  { %v625_v14 = vunpack.i.h.bf16 %v623_v11  ;;  %v624_v15 = vunpack.i.l.bf16 %v623_v11  ;;  %v635_v16 = vunpack.i.h.bf16 %v633_v13  ;;  %v634_v17 = vunpack.i.l.bf16 %v633_v13 }
  0x8d   :  { %v843_v18 = vsel %vm35_vm0, %v624_v15, %v625_v14  ;;  %v67_v19 = vsel %vm35_vm0, %v625_v14, %v624_v15  ;;  %v849_v20 = vsel %vm53_vm2, %v634_v17, %v635_v16  ;;  %v55_v21 = vsel %vm53_vm2, %v635_v16, %v634_v17 }
  0x8e   :  { %v856_v22 = vsel %vm35_vm0, %v810_v0, %v67_v19  ;;  %v864_v24 = vsel %vm38_vm1, %v816_v2, %v55_v21  ;;  %v628_v25 = vpop.permute.xlu0 %627  ;;  %v638_v26 = vpop.permute.xlu1 %637 }
  0x8f   :  { %v594_v28 = vpack.c.bf16 %v843_v18, %v856_v22  ;;  %v600_v29 = vpack.c.bf16 %v864_v24, %v849_v20  ;;  %v630_v30 = vunpack.i.h.bf16 %v628_v25  ;;  %v629_v31 = vunpack.i.l.bf16 %v628_v25 }
  0x90   :  { %v640_v33 = vunpack.i.h.bf16 %v638_v26  ;;  %v639_v34 = vunpack.i.l.bf16 %v638_v26  ;;  %v666_v35 = vpack.i.bf16 %v843_v18, %v856_v22  ;;  %v681_v56 = vpack.i.bf16 %v864_v24, %v849_v20 }
  0x91   :  { %v116_v36 = vrot.slane %v594_v28, 6  ;;  %v205_v37 = vrot.slane %v600_v29, 6  ;;  %v879_v38 = vsel %vm35_vm0, %v629_v31, %v630_v30  ;;  %v235_v39 = vsel %vm35_vm0, %v630_v30, %v629_v31 }
  0x92   :  { %v886_v40 = vsel %vm35_vm0, %v812_v1, %v235_v39  ;;  %v890_v41 = vsel %vm53_vm2, %v639_v34, %v640_v33  ;;  %v227_v42 = vsel %vm53_vm2, %v640_v33, %v639_v34  ;;  %667 = vrot.lane.b32.xlu1 %v666_v35, %s773_s27  ;;  %662 = vrot.lane.b32.xlu0 %v666_v35, %s774_s28  ;;  %v648_v43 = vpop.permute.xlu1 %647  ;;  %v643_v44 = vpop.permute.xlu0 %642  ;;  %v775_v28 = vmov 0   ;;  %v382_v35 = vld [vmem:[%s1067_s2] sm:$0xff] }
  0x93   :  { %118 = vst [vmem:[#allocation2] sm:$0xcc] %v116_v36  ;;  %207 = vst [vmem:[#allocation2 + $0x30] sm:$0xcc] %v205_v37  ;;  %v603_v45 = vpack.c.bf16 %v879_v38, %v886_v40  ;;  %v901_v46 = vsel %vm38_vm1, %v820_v3, %v227_v42  ;;  %v676_v47 = vpack.i.bf16 %v879_v38, %v886_v40  ;;  %v650_v53 = vunpack.i.h.bf16 %v648_v43 }
  0x94   :  { %v609_v48 = vpack.c.bf16 %v901_v46, %v890_v41  ;;  %v686_v52 = vpack.i.bf16 %v901_v46, %v890_v41  ;;  %v649_v54 = vunpack.i.l.bf16 %v648_v43  ;;  %v645_v57 = vunpack.i.h.bf16 %v643_v44  ;;  %43 = vst [vmem:[#allocation2 + $0x40] sm:$0xcc] %v775_v28  ;;  %44 = vst [vmem:[#allocation2 + $0x48] sm:$0xcc] %v775_v28  ;;  %487 = vmatprep.mubr.bf16.mxu0 %v775_v28 }
  0x95   :  { %v270_v51 = vrot.slane %v603_v45, 6  ;;  %v644_v58 = vunpack.i.l.bf16 %v643_v44  ;;  %528 = vmatprep.mubr.bf16.mxu1 %v775_v28  ;;  %701 = vset.pattern.permute.xlu0 %v775_v28 }
  0x96   :  { %v359_v55 = vrot.slane %v609_v48, 6  ;;  %677 = vrot.lane.b32.xlu1 %v676_v47, %s773_s27  ;;  %672 = vrot.lane.b32.xlu0 %v676_v47, %s774_s28  ;;  %v658_v59 = vpop.permute.xlu1 %657  ;;  %v294_v60 = vsel %vm91_vm5, %v649_v54, %v650_v53  ;;  %v295_v61 = vsel %vm91_vm5, %v650_v53, %v649_v54  ;;  %v653_v4 = vpop.permute.xlu0 %652 }
  0x97   :  { %272 = vst [vmem:[#allocation2 + $0x8] sm:$0xcc] %v270_v51  ;;  %v660_v62 = vunpack.i.h.bf16 %v658_v59  ;;  %v659_v63 = vunpack.i.l.bf16 %v658_v59  ;;  %v296_v5 = vsel %vm907_vm6, %v812_v1, %v295_v61  ;;  %v297_v6 = vsel %vm858_vm3, %v820_v3, %v294_v60 }
  0x98   :  { %361 = vst [vmem:[#allocation2 + $0x38] sm:$0xcc] %v359_v55  ;;  %v140_v8 = vsel %vm91_vm5, %v644_v58, %v645_v57  ;;  %v141_v9 = vsel %vm91_vm5, %v645_v57, %v644_v58  ;;  %v605_v10 = vpack.c.bf16 %v297_v6, %v296_v5  ;;  %v655_v17 = vunpack.i.h.bf16 %v653_v4 }
  0x99   :  { %v142_v11 = vsel %vm907_vm6, %v810_v0, %v141_v9  ;;  %v143_v12 = vsel %vm858_vm3, %v816_v2, %v140_v8  ;;  %v286_v13 = vsel %vm78_vm8, %v659_v63, %v660_v62  ;;  %v287_v15 = vsel %vm78_vm8, %v660_v62, %v659_v63 }
  0x9a   :  { %687 = vrot.lane.b32.xlu1 %v686_v52, %s773_s27  ;;  %682 = vrot.lane.b32.xlu0 %v681_v56, %s773_s27  ;;  %v596_v14 = vpack.c.bf16 %v143_v12, %v142_v11  ;;  %v288_v16 = vsel %vm911_vm7, %v812_v1, %v286_v13  ;;  %v305_v19 = vrot.slane %v605_v10, 6  ;;  %v289_v21 = vsel %vm871_vm4, %v820_v3, %v287_v15 }
  0x9b   :  { %v654_v25 = vunpack.i.l.bf16 %v653_v4  ;;  %v607_v27 = vpack.c.bf16 %v289_v21, %v288_v16 }
  0x9c   :  { %v151_v26 = vrot.slane %v596_v14, 6  ;;  %307 = vst [vmem:[#allocation2 + $0x18] sm:$0xcc] %v305_v19 }
  0x9d   :  { %v132_v29 = vsel %vm78_vm8, %v654_v25, %v655_v17  ;;  %v133_v1 = vsel %vm78_vm8, %v655_v17, %v654_v25  ;;  %v324_v3 = vrot.slane %v607_v27, 6 }
  0x9e   :  { %697 = vrot.lane.b32.xlu1 %v686_v52, %s774_s28  ;;  %692 = vrot.lane.b32.xlu0 %v681_v56, %s774_s28  ;;  %153 = vst [vmem:[#allocation2 + $0x10] sm:$0xcc] %v151_v26  ;;  %v134_v30 = vsel %vm911_vm7, %v810_v0, %v132_v29  ;;  %v135_v31 = vsel %vm871_vm4, %v816_v2, %v133_v1 }
  0x9f   :  { %v598_v33 = vpack.c.bf16 %v135_v31, %v134_v30  ;;  %326 = vst [vmem:[#allocation2 + $0x28] sm:$0xcc] %v324_v3 }
  0xa1   :  { %v170_v34 = vrot.slane %v598_v33, 6 }
  0xa2   :  { %385 = vperm.xlu0 %701, %v382_v35  }
  0xa3   :  { %172 = vst [vmem:[#allocation2 + $0x20] sm:$0xcc] %v170_v34 }
 0x104   :  { %v668_v36 = vpop.permute.xlu1 %667  ;;  %v663_v37 = vpop.permute.xlu0 %662 }
 0x105   :  { %v670_v39 = vunpack.i.h.bf16 %v668_v36  ;;  %v669_v42 = vunpack.i.l.bf16 %v668_v36  ;;  %v665_v43 = vunpack.i.h.bf16 %v663_v37  ;;  %v664_v44 = vunpack.i.l.bf16 %v663_v37 }
 0x107   :  { %v92_v0 = vsel %vm91_vm5, %v669_v42, %v670_v39  ;;  %v93_v2 = vsel %vm91_vm5, %v670_v39, %v669_v42  ;;  %v79_v45 = vsel %vm78_vm8, %v664_v44, %v665_v43  ;;  %v80_v47 = vsel %vm78_vm8, %v665_v43, %v664_v44 }
 0x108   :  { %v98_v48 = vsel %vm907_vm6, %v856_v22, %v93_v2  ;;  %v99_v51 = vsel %vm858_vm3, %v843_v18, %v92_v0  ;;  %v85_v52 = vsel %vm911_vm7, %v856_v22, %v79_v45  ;;  %v86_v53 = vsel %vm871_vm4, %v843_v18, %v80_v47  ;;  %v678_v54 = vpop.permute.xlu1 %677  ;;  %v673_v55 = vpop.permute.xlu0 %672 }
 0x109   :  { %v593_v56 = vpack.c.bf16 %v99_v51, %v98_v48  ;;  %v595_v57 = vpack.c.bf16 %v86_v53, %v85_v52  ;;  %v680_v58 = vunpack.i.h.bf16 %v678_v54  ;;  %v679_v59 = vunpack.i.l.bf16 %v678_v54 }
 0x10a   :  { %v675_v60 = vunpack.i.h.bf16 %v673_v55  ;;  %v674_v61 = vunpack.i.l.bf16 %v673_v55 }
 0x10b   :  { %108 = vst [vmem:[#allocation2] sm:$0x33] %v593_v56  ;;  %127 = vst [vmem:[#allocation2 + $0x10] sm:$0x33] %v595_v57  ;;  %v250_v62 = vsel %vm91_vm5, %v679_v59, %v680_v58  ;;  %v251_v22 = vsel %vm91_vm5, %v680_v58, %v679_v59  ;;  %v371_v56 = vld [vmem:[%s1066_s1] sm:$0xf] }
 0x10c   :  { %v252_v18 = vsel %vm907_vm6, %v886_v40, %v251_v22  ;;  %v253_v63 = vsel %vm858_vm3, %v879_v38, %v250_v62  ;;  %v242_v4 = vsel %vm78_vm8, %v674_v61, %v675_v60  ;;  %v243_v5 = vsel %vm78_vm8, %v675_v60, %v674_v61  ;;  %v688_v6 = vpop.permute.xlu1 %687  ;;  %v683_v8 = vpop.permute.xlu0 %682  ;;  %s742_s1 = scalar_lea.vmem %s548_s6, 512 }
 0x10d   :  { %v602_v9 = vpack.c.bf16 %v253_v63, %v252_v18  ;;  %v244_v10 = vsel %vm911_vm7, %v886_v40, %v242_v4  ;;  %v245_v11 = vsel %vm871_vm4, %v879_v38, %v243_v5  ;;  %v690_v12 = vunpack.i.h.bf16 %v688_v6  ;;  %p743_p8 = scmp.ne.s32.totalorder %s548_s6, %s742_s1  ;;  %p748_p10 = scmp.lt.s32.totalorder %s742_s1, %s742_s1 }
 0x10e   :  { %v604_v13 = vpack.c.bf16 %v245_v11, %v244_v10  ;;  %v689_v14 = vunpack.i.l.bf16 %v688_v6  ;;  %v685_v15 = vunpack.i.h.bf16 %v683_v8  ;;  %v684_v16 = vunpack.i.l.bf16 %v683_v8 }
 0x10f   :  { %262 = vst [vmem:[#allocation2 + $0x8] sm:$0x33] %v602_v9  ;;  %p749_p11 = por %p748_p10, %p747_p9 }
 0x110   :  { %281 = vst [vmem:[#allocation2 + $0x18] sm:$0x33] %v604_v13  ;;  %v339_v17 = vsel %vm91_vm5, %v689_v14, %v690_v12  ;;  %v340_v19 = vsel %vm91_vm5, %v690_v12, %v689_v14  ;;  %v185_v40 = vsel %vm91_vm5, %v684_v16, %v685_v15  ;;  %v186_v21 = vsel %vm91_vm5, %v685_v15, %v684_v16  ;;  %v698_v38 = vpop.permute.xlu1 %697  ;;  %v693_v25 = vpop.permute.xlu0 %692 }
 0x111   :  { %v341_v26 = vsel %vm907_vm6, %v890_v41, %v340_v19  ;;  %v342_v27 = vsel %vm858_vm3, %v901_v46, %v339_v17  ;;  %v187_v28 = vsel %vm907_vm6, %v849_v20, %v186_v21  ;;  %v188_v29 = vsel %vm858_vm3, %v864_v24, %v185_v40  ;;  %p750_p12 = pnand %p749_p11, %p743_p8 }
 0x112   :  { %v608_v1 = vpack.c.bf16 %v342_v27, %v341_v26  ;;  %v599_v3 = vpack.c.bf16 %v188_v29, %v187_v28  ;;  %v700_v30 = vunpack.i.h.bf16 %v698_v38  ;;  %v699_v31 = vunpack.i.l.bf16 %v698_v38  ;;  %v704_v33 = vld [vmem:[#allocation2 + $0x4] ss:$16 sps:$4 sm:$0xff]   ;;  %v706_v36 = vld [vmem:[#allocation2] ss:$16 sps:$4 sm:$0xff]  }
 0x113   :  { %v695_v34 = vunpack.i.h.bf16 %v693_v25  ;;  %v694_v35 = vunpack.i.l.bf16 %v693_v25  ;;  %455 = vmatprep.subr.bf16.mxu0 %v704_v33 }
 0x114   :  { %351 = vst [vmem:[#allocation2 + $0x38] sm:$0x33] %v608_v1  ;;  %197 = vst [vmem:[#allocation2 + $0x30] sm:$0x33] %v599_v3  ;;  %v331_v37 = vsel %vm78_vm8, %v699_v31, %v700_v30  ;;  %v332_v49 = vsel %vm78_vm8, %v700_v30, %v699_v31  ;;  %456 = vmatpush1.bf16.msra.mxu0 %v706_v36 }
 0x115   :  { %v333_v23 = vsel %vm911_vm7, %v890_v41, %v331_v37  ;;  %v334_v39 = vsel %vm871_vm4, %v901_v46, %v332_v49  ;;  %v177_v42 = vsel %vm78_vm8, %v694_v35, %v695_v34  ;;  %v178_v43 = vsel %vm78_vm8, %v695_v34, %v694_v35 }
 0x116   :  { %v610_v44 = vpack.c.bf16 %v334_v39, %v333_v23  ;;  %v179_v0 = vsel %vm911_vm7, %v849_v20, %v177_v42  ;;  %v180_v41 = vsel %vm871_vm4, %v864_v24, %v178_v43 }
 0x117   :  { %v601_v2 = vpack.c.bf16 %v180_v41, %v179_v0  ;;  %v707_v45 = vld [vmem:[#allocation2 + $0xc] ss:$16 sps:$4 sm:$0xff]   ;;  %v709_v47 = vld [vmem:[#allocation2 + $0x8] ss:$16 sps:$4 sm:$0xff]  }
 0x118   :  { %370 = vst [vmem:[#allocation2 + $0x48] sm:$0x33] %v610_v44  ;;  %496 = vmatprep.subr.bf16.mxu1 %v707_v45 }
 0x119   :  { %216 = vst [vmem:[#allocation2 + $0x40] sm:$0x33] %v601_v2  ;;  %497 = vmatpush1.bf16.msra.mxu1 %v709_v47 }
 0x11b   :  { %v710_v46 = vld [vmem:[#allocation2 + $0x24] ss:$16 sps:$4 sm:$0xff]   ;;  %v712_v7 = vld [vmem:[#allocation2 + $0x2c] ss:$16 sps:$4 sm:$0xff]   ;;  %v714_v48 = vld [vmem:[#allocation2 + $0x20] ss:$16 sps:$4 sm:$0xff]  }
 0x11c   :  { %v715_v51 = vld [vmem:[#allocation2 + $0x28] ss:$16 sps:$4 sm:$0xff]   ;;  %457 = vmatprep.subr.bf16.mxu0 %v710_v46  ;;  %498 = vmatprep.subr.bf16.mxu1 %v712_v7 }
 0x11d   :  { %458 = vmatpush1.bf16.msra.mxu0 %v714_v48  ;;  %499 = vmatpush1.bf16.msra.mxu1 %v715_v51 }
 0x11f   :  { %v381_v20 = vld [vmem:[#allocation2 + $0x48] sm:$0xff] }
 0x120   :  { %v380_v50 = vld [vmem:[#allocation2 + $0x40] sm:$0xff]  ;;  %v588_v32 = vcombine.high %v381_v20, %v381_v20  ;;  %v587_v24 = vcombine.low %v381_v20, %v381_v20 }
 0x121   :  { %v586_v52 = vcombine.high %v380_v50, %v380_v50  ;;  %v585_v53 = vcombine.low %v380_v50, %v380_v50  ;;  %v386_v57 = vpop.permute.xlu0 %385 }
 0x122   :  { %591 = vmatprep.subr.msk.bf16.mxu1 %vm442_vm9, %v588_v32  ;;  %v450_v54 = vsel %vm442_vm9, %v587_v24, 0 }
 0x123   :  { %589 = vmatprep.subr.msk.bf16.mxu0 %vm442_vm9, %v586_v52  ;;  %v444_v55 = vsel %vm442_vm9, %v585_v53, 0  ;;  %501 = vmatpush1.bf16.msra.mxu1 %v450_v54 }
 0x124   :  { %460 = vmatpush1.bf16.msra.mxu0 %v444_v55 }
 0x126   :  { %592 = vmatmul.mubr.msk.bf16.vlgmr.msra.gmra.mrb[0].mxu1 %vm438_vm10, %v371_v56 }
 0x127   :  { %590 = vmatmul.mubr.msk.bf16.vlgmr.msra.gmra.mrb[0].mxu0 %vm438_vm10, %v371_v56 }
 0x1f9   :  { %v530_v58 = vpop.f32.mrb[0].mxu1 }
 0x1fa   :  { %v489_v59 = vpop.f32.mrb[0].mxu0  ;;  %v531_v60 = vadd.f32 %v530_v58, %v386_v57  ;;  %v532_v61 = vpop.f32.mrb[1].mxu1 }
 0x1fb   :  { %v490_v62 = vadd.f32 %v489_v59, %v386_v57  ;;  %v491_v22 = vpop.f32.mrb[1].mxu0  ;;  %v533_v18 = vadd.f32 %v532_v61, %v386_v57  ;;  %v534_v63 = vpop.f32.mrb[2].mxu1 }
 0x1fc   :  { %540 = vst [vmem:[#allocation6 + $0x10] sm:$0xff] %v531_v60  ;;  %v492_v4 = vadd.f32 %v491_v22, %v386_v57  ;;  %v493_v5 = vpop.f32.mrb[2].mxu0  ;;  %v535_v6 = vpop.f32.mrb[3].mxu1 }
 0x1fd   :  { %537 = vst [vmem:[#allocation6] sm:$0xff] %v490_v62  ;;  %541 = vst [vmem:[#allocation6 + $0x18] sm:$0xff] %v533_v18  ;;  %v494_v8 = vpop.f32.mrb[3].mxu0 }
 0x1fe   :  { %538 = vst [vmem:[#allocation6 + $0x8] sm:$0xff] %v492_v4 }
 0x1ff   :  { %753 = shalt.err (!%p750_p12)
}
 0x200   :  { %s754_s9 = scalar_lea.hbm %s1068_s3, 512 }
 0x201   :  { %p755_p13 = scmp.ne.s32.totalorder %s1068_s3, %s754_s9  ;;  %p758_p0 = scmp.lt.u32.totalorder %s754_s9, %s1068_s3 }
 0x203   :  { %p760_p1 = pnand %p758_p0, %p755_p13 }
 0x205   :  { %763 = shalt.err (!%p760_p1)
}
 0x206   :  { %s777_s14 = smov 256  }
 0x207   :  { %553 = dma.vmem_to_hbm [thread:$0]  %s548_s6, 512, %s1068_s3, [#allocation5], %s777_s14, %s777_s14, %s771_s26  }
 0x208   :  { %766 = dma.done.wait [#allocation5], 512  }
 0x209   :  { %767 = vsyncadd [#allocation5], 4294966784 }
 0x20a   :  { %557 = vsyncpa [#allocation4], 1 }
 0x20b   :  { %558 = vsyncpa [#allocation5], 1 }

</bundles_post_ra>
